<compile_context>
chip_gen: v5e
topology: v5e:2x2
jax: 0.10.0
libtpu: 0.0.40
codegen_flags: <defaults>
</compile_context>

<pallas_src>
import math
from functools import partial

import jax
import jax.numpy as jnp
from jax import lax
from jax.experimental import pallas as pl
from jax.experimental.pallas import tpu as pltpu

BN_EPS = 1e-5
TILE_ROWS = 512              # 512x128 f32 tile = 256 KiB/buffer; sweep to 2048 on 128 MiB parts
_STATS_ROWS = 8              # per-chunk stats slab rows (sublane-aligned); rows 0/1 are used
VMEM_LIMIT = 48 * 1024 * 1024  # fits v7x's 64 MiB physical VMEM with headroom


# ----------------------- small helpers (plain JAX / Python glue) -----------------------
def _round_up(x, m):
    return ((x + m - 1) // m) * m


def _tile_for(n, tile_rows=TILE_ROWS):
    return min(tile_rows, _round_up(max(n, 1), 16))


def _grid_partition(n, tile):
    n_tiles = max((n + tile - 1) // tile, 1)
    chunks = 2 if n_tiles >= 2 else 1      # leading "parallel" axis -> v7x 2-TC sharding
    n_tiles = _round_up(n_tiles, chunks)
    return chunks, n_tiles // chunks, n_tiles * tile


def _pad_rows_to(x, n_target):
    n = x.shape[0]
    if n == n_target:
        return x
    pad = [(0, n_target - n)] + [(0, 0)] * (x.ndim - 1)
    return jnp.pad(x, pad)


def _offsets_to_batch_ids(offset, n):
    idx = jnp.arange(n)
    return jnp.sum(idx[:, None] >= offset[None, :], axis=1).astype(jnp.int32)


def knn_query(nsample, points, queries, point_offset, query_offset, q_chunk=512):
    # TODO(synk): pointops.knnquery is a CUDA extension; this is a segment-masked kNN
    #             chunked over queries using the MXU-friendly d^2 form so the full
    #             N1 x N2 matrix never materializes.  For huge coarse sets also tile
    #             over N2 with a running top-k (Pallas kernel).
    n_pts, n_q = points.shape[0], queries.shape[0]
    pb = _offsets_to_batch_ids(point_offset, n_pts)
    qb = _offsets_to_batch_ids(query_offset, n_q)
    p_sq = jnp.sum(points * points, axis=-1)

    n_q_pad = _round_up(max(n_q, 1), q_chunk)
    qp = _pad_rows_to(queries, n_q_pad)
    qbp = jnp.pad(qb, (0, n_q_pad - n_q))
    nchunks = n_q_pad // q_chunk

    def chunk_fn(arg):
        q, qb_c = arg
        d2 = (jnp.sum(q * q, axis=-1, keepdims=True) + p_sq[None, :]
              - 2.0 * (q @ points.T))
        d2 = jnp.where(qb_c[:, None] != pb[None, :], jnp.float32(1e10), d2)
        neg, idx = lax.top_k(-d2, nsample)
        return idx.astype(jnp.int32), jnp.sqrt(jnp.maximum(-neg, 0.0))

    idx, dist = lax.map(chunk_fn, (qp.reshape(nchunks, q_chunk, 3),
                                   qbp.reshape(nchunks, q_chunk)))
    return (idx.reshape(n_q_pad, nsample)[:n_q],
            dist.reshape(n_q_pad, nsample)[:n_q])


# ----------------------- Pallas kernels -----------------------
def _accum_stats(stats_ref, h):
    # rows 0 / 1 of the per-chunk slab: per-channel sum and sum of squares (f32).
    stats_ref[0:1, :] += jnp.sum(h, axis=0, keepdims=True)
    stats_ref[1:2, :] += jnp.sum(h * h, axis=0, keepdims=True)


def _linear_stats_kernel(x_ref, w_ref, h_ref, stats_ref):
    # h = x @ W (bias dropped: cancelled exactly by training-mode BN mean subtraction);
    # padded rows are zero so they contribute 0 to the stats.
    @pl.when(pl.program_id(1) == 0)
    def _():
        stats_ref[...] = jnp.zeros_like(stats_ref)

    h = jnp.dot(x_ref[...], w_ref[...], preferred_element_type=jnp.float32)
    h_ref[...] = h.astype(h_ref.dtype)
    _accum_stats(stats_ref, h)


def _matmul_stats_tail(a, w_ref, hn_ref, stats_ref, n_valid, tile, tpc):
    # zero padded rows, bf16 matmul (f32 accumulate), bf16 store, f32 stats accumulate.
    @pl.when(pl.program_id(1) == 0)
    def _():
        stats_ref[...] = jnp.zeros_like(stats_ref)

    row0 = (pl.program_id(0) * tpc + pl.program_id(1)) * tile
    row = row0 + lax.broadcasted_iota(jnp.int32, (tile, 1), 0)
    a = jnp.where(row < n_valid, a, 0.0)
    hn = jnp.dot(a.astype(jnp.bfloat16), w_ref[...], preferred_element_type=jnp.float32)
    hn_ref[...] = hn.astype(hn_ref.dtype)
    _accum_stats(stats_ref, hn)


def _scale_relu_linear_stats_kernel(h_ref, s_ref, t_ref, w_ref, hn_ref, stats_ref,
                                    *, n_valid, tile, tpc):
    a = jnp.maximum(h_ref[...].astype(jnp.float32) * s_ref[...] + t_ref[...], 0.0)
    _matmul_stats_tail(a, w_ref, hn_ref, stats_ref, n_valid, tile, tpc)


def _combine_pre(interp, sf, tf, hs=None, ss=None, ts=None):
    # interp is already sum_i w_i * h2_raw[idx_i]; the f0 BN affine folds through the
    # weighted sum because sum_i w_i == 1.
    a = interp * sf + tf
    if hs is not None:
        a = a + hs.astype(jnp.float32) * ss + ts
    return jnp.maximum(a, 0.0)


def _combine_skip_linear_kernel(i_ref, sf_ref, tf_ref, hs_ref, ss_ref, ts_ref,
                                w_ref, hn_ref, stats_ref, *, n_valid, tile, tpc):
    a = _combine_pre(i_ref[...], sf_ref[...], tf_ref[...],
                     hs_ref[...], ss_ref[...], ts_ref[...])
    _matmul_stats_tail(a, w_ref, hn_ref, stats_ref, n_valid, tile, tpc)


def _combine_noskip_linear_kernel(i_ref, sf_ref, tf_ref, w_ref, hn_ref, stats_ref,
                                  *, n_valid, tile, tpc):
    a = _combine_pre(i_ref[...], sf_ref[...], tf_ref[...])
    _matmul_stats_tail(a, w_ref, hn_ref, stats_ref, n_valid, tile, tpc)


def _combine_skip_relu_kernel(i_ref, sf_ref, tf_ref, hs_ref, ss_ref, ts_ref, o_ref):
    o_ref[...] = _combine_pre(i_ref[...], sf_ref[...], tf_ref[...],
                              hs_ref[...], ss_ref[...], ts_ref[...])


def _combine_noskip_relu_kernel(i_ref, sf_ref, tf_ref, o_ref):
    o_ref[...] = _combine_pre(i_ref[...], sf_ref[...], tf_ref[...])


def _scale_relu_kernel(h_ref, s_ref, t_ref, o_ref):
    o_ref[...] = jnp.maximum(h_ref[...].astype(jnp.float32) * s_ref[...] + t_ref[...], 0.0)


# ----------------------- pallas_call wrappers -----------------------
def _params(semantics):
    return pltpu.CompilerParams(dimension_semantics=semantics,
                                vmem_limit_bytes=VMEM_LIMIT)


def _row_spec(tile, cols, tpc):
    return pl.BlockSpec((tile, cols), lambda c, i: (c * tpc + i, 0))


def _full_spec(shape):
    return pl.BlockSpec(shape, lambda c, i: (0,) * len(shape))


def _stats_spec(cout):
    return pl.BlockSpec((_STATS_ROWS, cout), lambda c, i: (c, 0))


def _cost(n_rows, cin, cout):
    return pl.CostEstimate(flops=2 * n_rows * cin * cout, transcendentals=0,
                           bytes_accessed=2 * (n_rows * cin + cin * cout + n_rows * cout))


def _fold_bn(stats, n_valid, gamma, beta):
    stats = stats.reshape(-1, _STATS_ROWS, stats.shape[-1])       # [chunks, 8, C]
    mean = jnp.sum(stats[:, 0, :], axis=0) / n_valid
    var = jnp.sum(stats[:, 1, :], axis=0) / n_valid - mean * mean  # biased, as PyTorch
    var = jnp.maximum(var, 0.0)                                    # single-pass var can cancel <0
    s = gamma * lax.rsqrt(var + BN_EPS)
    t = beta - mean * s
    return s.reshape(1, -1), t.reshape(1, -1)


def linear_bn_fold(x, w, gamma, beta, n_valid, out_dtype=jnp.bfloat16):
    """h = x @ w (rows zero-padded to a tile multiple) + folded training-mode BN (s, t)."""
    n = x.shape[0]
    tile = _tile_for(n)
    chunks, tpc, n_pad = _grid_partition(n, tile)
    xp = _pad_rows_to(x, n_pad).astype(jnp.bfloat16)
    cin, cout = w.shape
    h, stats = pl.pallas_call(
        _linear_stats_kernel,
        grid=(chunks, tpc),
        in_specs=[_row_spec(tile, cin, tpc), _full_spec((cin, cout))],
        out_specs=(_row_spec(tile, cout, tpc), _stats_spec(cout)),
        out_shape=(jax.ShapeDtypeStruct((n_pad, cout), out_dtype),
                   jax.ShapeDtypeStruct((_STATS_ROWS * chunks, cout), jnp.float32)),
        compiler_params=_params(("parallel", "arbitrary")),
        cost_estimate=_cost(n_pad, cin, cout),
    )(xp, w.astype(jnp.bfloat16))
    s, t = _fold_bn(stats, n_valid, gamma, beta)
    return h, s, t


def combine_linear_fold(interp, sf, tf, hs, ss, ts, w, gamma, beta, n_valid):
    n, c0 = interp.shape
    tile = _tile_for(n)
    chunks, tpc, n_pad = _grid_partition(n, tile)
    interp_p = _pad_rows_to(interp, n_pad).astype(jnp.float32)
    cout = w.shape[1]
    common = dict(n_valid=n_valid, tile=tile, tpc=tpc)
    if hs is not None:
        hs_p = hs if hs.shape[0] == n_pad else _pad_rows_to(hs[:n], n_pad)
        kern = partial(_combine_skip_linear_kernel, **common)
        in_specs = [_row_spec(tile, c0, tpc), _full_spec((1, c0)), _full_spec((1, c0)),
                    _row_spec(tile, c0, tpc), _full_spec((1, c0)), _full_spec((1, c0)),
                    _full_spec((c0, cout))]
        args = (interp_p, sf, tf, hs_p, ss, ts, w.astype(jnp.bfloat16))
    else:
        kern = partial(_combine_noskip_linear_kernel, **common)
        in_specs = [_row_spec(tile, c0, tpc), _full_spec((1, c0)), _full_spec((1, c0)),
                    _full_spec((c0, cout))]
        args = (interp_p, sf, tf, w.astype(jnp.bfloat16))
    hn, stats = pl.pallas_call(
        kern,
        grid=(chunks, tpc),
        in_specs=in_specs,
        out_specs=(_row_spec(tile, cout, tpc), _stats_spec(cout)),
        out_shape=(jax.ShapeDtypeStruct((n_pad, cout), jnp.bfloat16),
                   jax.ShapeDtypeStruct((_STATS_ROWS * chunks, cout), jnp.float32)),
        compiler_params=_params(("parallel", "arbitrary")),
        cost_estimate=_cost(n_pad, c0, cout),
    )(*args)
    s2, t2 = _fold_bn(stats, n_valid, gamma, beta)
    return hn, s2, t2


def combine_relu(interp, sf, tf, hs, ss, ts, n_valid):
    n, c0 = interp.shape
    tile = _tile_for(n)
    chunks, tpc, n_pad = _grid_partition(n, tile)
    interp_p = _pad_rows_to(interp, n_pad).astype(jnp.float32)
    if hs is not None:
        hs_p = hs if hs.shape[0] == n_pad else _pad_rows_to(hs[:n], n_pad)
        kern = _combine_skip_relu_kernel
        in_specs = [_row_spec(tile, c0, tpc), _full_spec((1, c0)), _full_spec((1, c0)),
                    _row_spec(tile, c0, tpc), _full_spec((1, c0)), _full_spec((1, c0))]
        args = (interp_p, sf, tf, hs_p, ss, ts)
    else:
        kern = _combine_noskip_relu_kernel
        in_specs = [_row_spec(tile, c0, tpc), _full_spec((1, c0)), _full_spec((1, c0))]
        args = (interp_p, sf, tf)
    return pl.pallas_call(
        kern,
        grid=(chunks, tpc),
        in_specs=in_specs,
        out_specs=_row_spec(tile, c0, tpc),
        out_shape=jax.ShapeDtypeStruct((n_pad, c0), jnp.float32),
        compiler_params=_params(("parallel", "parallel")),
    )(*args)


def scale_relu_linear_fold(h, s, t, w, gamma, beta, n_valid):
    tile = _tile_for(n_valid)
    chunks, tpc, n_pad = _grid_partition(n_valid, tile)
    assert h.shape[0] == n_pad
    cin, cout = h.shape[1], w.shape[1]
    kern = partial(_scale_relu_linear_stats_kernel, n_valid=n_valid, tile=tile, tpc=tpc)
    hn, stats = pl.pallas_call(
        kern,
        grid=(chunks, tpc),
        in_specs=[_row_spec(tile, cin, tpc), _full_spec((1, cin)), _full_spec((1, cin)),
                  _full_spec((cin, cout))],
        out_specs=(_row_spec(tile, cout, tpc), _stats_spec(cout)),
        out_shape=(jax.ShapeDtypeStruct((n_pad, cout), jnp.bfloat16),
                   jax.ShapeDtypeStruct((_STATS_ROWS * chunks, cout), jnp.float32)),
        compiler_params=_params(("parallel", "arbitrary")),
        cost_estimate=_cost(n_pad, cin, cout),
    )(h, s, t, w.astype(jnp.bfloat16))
    s2, t2 = _fold_bn(stats, n_valid, gamma, beta)
    return hn, s2, t2


def scale_relu(h, s, t, n_valid):
    tile = _tile_for(n_valid)
    chunks, tpc, n_pad = _grid_partition(n_valid, tile)
    assert h.shape[0] == n_pad
    c = h.shape[1]
    return pl.pallas_call(
        _scale_relu_kernel,
        grid=(chunks, tpc),
        in_specs=[_row_spec(tile, c, tpc), _full_spec((1, c)), _full_spec((1, c))],
        out_specs=_row_spec(tile, c, tpc),
        out_shape=jax.ShapeDtypeStruct((n_pad, c), jnp.float32),
        compiler_params=_params(("parallel", "parallel")),
    )(h, s, t)


# ----------------------- module -----------------------
class SurfaceFeaturePropagationCDPallas:
    """Surface FP module w/ channel de-differentiation; BN in training mode."""

    def __init__(self, prev_channel, skip_channel, mlp, seed=0):
        self.skip = skip_channel is not None
        self.mlp = list(mlp)

        def linear_params(key, cin, cout):
            kw, kb = jax.random.split(key)
            bound = 1.0 / math.sqrt(cin)
            w = jax.random.uniform(kw, (cin, cout), jnp.float32, -bound, bound)
            b = jax.random.uniform(kb, (cout,), jnp.float32, -bound, bound)
            return w, b

        n_lin = 1 + (1 if self.skip else 0) + max(len(mlp) - 1, 0)
        keys = jax.random.split(jax.random.PRNGKey(seed), n_lin)
        ki = 0
        # NOTE: linear biases (b_*) are kept as parameters for fidelity but are NOT used
        # in the Pallas path: training-mode BN mean subtraction cancels them exactly.
        self.w_f0, self.b_f0 = linear_params(keys[ki], prev_channel, mlp[0]); ki += 1
        self.g_f0 = jnp.ones((mlp[0],), jnp.float32)
        self.be_f0 = jnp.zeros((mlp[0],), jnp.float32)
        if self.skip:
            self.w_s0, self.b_s0 = linear_params(keys[ki], skip_channel, mlp[0]); ki += 1
            self.g_s0 = jnp.ones((mlp[0],), jnp.float32)
            self.be_s0 = jnp.zeros((mlp[0],), jnp.float32)
        self.convs = []
        last = mlp[0]
        for cout in mlp[1:]:
            w, b = linear_params(keys[ki], last, cout); ki += 1
            self.convs.append(dict(w=w, b=b,
                                   gamma=jnp.ones((cout,), jnp.float32),
                                   beta=jnp.zeros((cout,), jnp.float32)))
            last = cout

    def __call__(self, pos_feat_off1, pos_feat_off2):
        xyz1, points1, offset1 = pos_feat_off1
        xyz2, points2, offset2 = pos_feat_off2
        n1, n2 = xyz1.shape[0], xyz2.shape[0]

        # 3-NN inverse-distance interpolation weights (pointops.knnquery replacement)
        idx, dist = knn_query(3, xyz2, xyz1, offset2, offset1)
        dist_recip = 1.0 / (dist + 1e-8)
        weight = dist_recip / jnp.sum(dist_recip, axis=1, keepdims=True)   # [N1, 3]

        # coarse branch: h2 = points2 @ W_f0 (small, kept f32); BN folded to (s_f0, t_f0)
        h2, s_f0, t_f0 = linear_bn_fold(points2.astype(jnp.float32), self.w_f0,
                                        self.g_f0, self.be_f0, n2,
                                        out_dtype=jnp.float32)
        # TODO(synk): the 3-row gather + weighted sum stays in XLA as ONE fused N1 x C
        #             stream; fusing it into the combine kernel needs an in-kernel
        #             dynamic VMEM gather or per-row DMA via scalar-prefetched idx.
        interp = (h2[idx[:, 0]] * weight[:, 0:1] +
                  h2[idx[:, 1]] * weight[:, 1:2] +
                  h2[idx[:, 2]] * weight[:, 2:3])

        if self.skip:
            hs, s_s0, t_s0 = linear_bn_fold(points1.astype(jnp.float32), self.w_s0,
                                            self.g_s0, self.be_s0, n1)
        else:
            hs = s_s0 = t_s0 = None

        if not self.convs:
            out = combine_relu(interp, s_f0, t_f0, hs, s_s0, t_s0, n1)
            return out[:n1]

        conv0 = self.convs[0]
        h, s, t = combine_linear_fold(interp, s_f0, t_f0, hs, s_s0, t_s0,
                                      conv0["w"], conv0["gamma"], conv0["beta"], n1)
        for conv in self.convs[1:]:
            h, s, t = scale_relu_linear_fold(h, s, t, conv["w"], conv["gamma"],
                                             conv["beta"], n1)
        out = scale_relu(h, s, t, n1)
        return out[:n1]


# ----------------------- pure-JAX reference (mirrors the PyTorch forward) ------------
def _bn_train(x, gamma, beta):
    mean = jnp.mean(x, axis=0, keepdims=True)
    var = jnp.mean((x - mean) ** 2, axis=0, keepdims=True)
    return (x - mean) * lax.rsqrt(var + BN_EPS) * gamma + beta


def reference_forward(m, pos_feat_off1, pos_feat_off2):
    xyz1, points1, offset1 = pos_feat_off1
    xyz2, points2, offset2 = pos_feat_off2
    idx, dist = knn_query(3, xyz2, xyz1, offset2, offset1)
    dist_recip = 1.0 / (dist + 1e-8)
    weight = dist_recip / jnp.sum(dist_recip, axis=1, keepdims=True)
    p2 = _bn_train(points2 @ m.w_f0 + m.b_f0, m.g_f0, m.be_f0)
    interp = jnp.zeros((xyz1.shape[0], p2.shape[1]), jnp.float32)
    for i in range(3):
        interp = interp + p2[idx[:, i]] * weight[:, i:i + 1]
    if m.skip:
        skip = _bn_train(points1 @ m.w_s0 + m.b_s0, m.g_s0, m.be_s0)
        new_points = jax.nn.relu(interp + skip)
    else:
        new_points = jax.nn.relu(interp)
    for conv in m.convs:
        new_points = jax.nn.relu(
            _bn_train(new_points @ conv["w"] + conv["b"], conv["gamma"], conv["beta"]))
    return new_points


# ----------------------- demo -----------------------
if __name__ == "__main__":
    key = jax.random.PRNGKey(0)
    ks = jax.random.split(key, 4)

    # n1 > TILE_ROWS so the 2-chunk ("parallel") stats path is exercised; 2 batch segments.
    n1, n2 = 1500, 400
    prev_channel, skip_channel = 16, 8
    mlp = [128, 128, 128]               # 128-multiples -> lane-dense stores on every layer

    xyz1 = jax.random.normal(ks[0], (n1, 3), jnp.float32)
    xyz2 = jax.random.normal(ks[1], (n2, 3), jnp.float32)
    points1 = jax.random.normal(ks[2], (n1, skip_channel), jnp.float32)
    points2 = jax.random.normal(ks[3], (n2, prev_channel), jnp.float32)
    offset1 = jnp.array([800, 1500], jnp.int32)   # cumulative segment ends (dense)
    offset2 = jnp.array([220, 400], jnp.int32)    # cumulative segment ends (coarse)

    # main config: skip branch + 3-layer mlp
    module = SurfaceFeaturePropagationCDPallas(prev_channel, skip_channel, mlp, seed=0)
    out = jax.block_until_ready(module((xyz1, points1, offset1), (xyz2, points2, offset2)))
    assert out.shape == (n1, mlp[-1])
    ref = reference_forward(module, (xyz1, points1, offset1), (xyz2, points2, offset2))
    err = float(jnp.max(jnp.abs(out - ref)))
    assert err < 5e-2, f"max abs err vs reference (bf16 matmul path): {err}"

    # no-skip / no-conv config exercises the dedicated no-skip combine kernel
    module2 = SurfaceFeaturePropagationCDPallas(prev_channel, None, [128], seed=1)
    out2 = jax.block_until_ready(module2((xyz1, points1, offset1), (xyz2, points2, offset2)))
    assert out2.shape == (n1, 128)
    ref2 = reference_forward(module2, (xyz1, points1, offset1), (xyz2, points2, offset2))
    err2 = float(jnp.max(jnp.abs(out2 - ref2)))
    assert err2 < 5e-2, f"max abs err vs reference (no-skip path): {err2}"

    print("KERNEL_OK")
</pallas_src>

<mosaic_0001>
module attributes {stable_mosaic.version = 11 : i64} {
  func.func @_linear_stats_kernel(%arg0: i32, %arg1: i32, %arg2: memref<400x16xbf16, #tpu.memory_space<vmem>>, %arg3: memref<16x128xbf16, #tpu.memory_space<vmem>>, %arg4: memref<400x128xf32, #tpu.memory_space<vmem>>, %arg5: memref<8x128xf32, #tpu.memory_space<vmem>>) attributes {dimension_semantics = [#tpu.dimension_semantics<parallel>, #tpu.dimension_semantics<arbitrary>], iteration_bounds = array<i64: 1, 1>, scalar_prefetch = 0 : i64, scratch_operands = 0 : i64, tpu.core_type = #tpu.core_type<tc>, window_params = [{transform_indices = @transform_0, window_bounds = array<i64: 400, 16>}, {pipeline_mode = #tpu.pipeline_mode<synchronous>, transform_indices = @transform_1, window_bounds = array<i64: 16, 128>}, {transform_indices = @transform_2, window_bounds = array<i64: 400, 128>}, {transform_indices = @transform_3, window_bounds = array<i64: 8, 128>}]} {
    %c0_i32 = arith.constant 0 : i32
    %0 = arith.cmpi eq, %arg1, %c0_i32 : i32
    %1 = arith.extui %0 : i1 to i32
    %c0_i32_0 = arith.constant 0 : i32
    %2 = arith.cmpi ne, %1, %c0_i32_0 : i32
    scf.if %2 {
      %cst_15 = arith.constant 0.000000e+00 : f32
      %18 = vector.broadcast %cst_15 : f32 to vector<8x128xf32>
      %c0_16 = arith.constant 0 : index
      %c0_17 = arith.constant 0 : index
      %19 = vector.load %arg5[%c0_16, %c0_17] : memref<8x128xf32, #tpu.memory_space<vmem>>, vector<8x128xf32>
      tpu.vector_store %arg5[%c0_16, %c0_17], %18 {strides = array<i32>} : memref<8x128xf32, #tpu.memory_space<vmem>>, vector<8x128xf32>,
    } else {
    }
    %c0 = arith.constant 0 : index
    %c0_1 = arith.constant 0 : index
    %3 = vector.load %arg2[%c0, %c0_1] : memref<400x16xbf16, #tpu.memory_space<vmem>>, vector<400x16xbf16>
    %c0_2 = arith.constant 0 : index
    %c0_3 = arith.constant 0 : index
    %4 = vector.load %arg3[%c0_2, %c0_3] : memref<16x128xbf16, #tpu.memory_space<vmem>>, vector<16x128xbf16>
    %cst = arith.constant dense<0.000000e+00> : vector<400x128xf32>
    %5 = tpu.matmul %3, %4, %cst {dimension_numbers = #tpu.dot_dimension_numbers<[1], [0], [0], [1], [0, 0, 1, 1], [], []>} : vector<400x16xbf16>, vector<16x128xbf16>, vector<400x128xf32> -> vector<400x128xf32>
    %c0_4 = arith.constant 0 : index
    %c0_5 = arith.constant 0 : index
    %6 = vector.load %arg4[%c0_4, %c0_5] : memref<400x128xf32, #tpu.memory_space<vmem>>, vector<400x128xf32>
    tpu.vector_store %arg4[%c0_4, %c0_5], %5 {strides = array<i32>} : memref<400x128xf32, #tpu.memory_space<vmem>>, vector<400x128xf32>,
    %c0_6 = arith.constant 0 : index
    %c0_7 = arith.constant 0 : index
    %7 = vector.load %arg5[%c0_6, %c0_7] : memref<8x128xf32, #tpu.memory_space<vmem>>, vector<1x128xf32>
    %cst_8 = arith.constant dense<0.000000e+00> : vector<128xf32>
    %8 = vector.multi_reduction <add>, %5, %cst_8 [0] : vector<400x128xf32> to vector<128xf32>
    %9 = vector.shape_cast %8 : vector<128xf32> to vector<1x128xf32>
    %10 = arith.addf %7, %9 : vector<1x128xf32>
    %c0_9 = arith.constant 0 : index
    %c0_10 = arith.constant 0 : index
    %11 = vector.load %arg5[%c0_9, %c0_10] : memref<8x128xf32, #tpu.memory_space<vmem>>, vector<1x128xf32>
    tpu.vector_store %arg5[%c0_9, %c0_10], %10 {strides = array<i32>} : memref<8x128xf32, #tpu.memory_space<vmem>>, vector<1x128xf32>,
    %c1 = arith.constant 1 : index
    %c0_11 = arith.constant 0 : index
    %12 = vector.load %arg5[%c1, %c0_11] : memref<8x128xf32, #tpu.memory_space<vmem>>, vector<1x128xf32>
    %13 = arith.mulf %5, %5 : vector<400x128xf32>
    %cst_12 = arith.constant dense<0.000000e+00> : vector<128xf32>
    %14 = vector.multi_reduction <add>, %13, %cst_12 [0] : vector<400x128xf32> to vector<128xf32>
    %15 = vector.shape_cast %14 : vector<128xf32> to vector<1x128xf32>
    %16 = arith.addf %12, %15 : vector<1x128xf32>
    %c1_13 = arith.constant 1 : index
    %c0_14 = arith.constant 0 : index
    %17 = vector.load %arg5[%c1_13, %c0_14] : memref<8x128xf32, #tpu.memory_space<vmem>>, vector<1x128xf32>
    tpu.vector_store %arg5[%c1_13, %c0_14], %16 {strides = array<i32>} : memref<8x128xf32, #tpu.memory_space<vmem>>, vector<1x128xf32>,
    return
  }
  func.func @transform_0(%arg0: i32, %arg1: i32) -> (i32, i32) {
    %c1_i32 = arith.constant 1 : i32
    %0 = arith.muli %arg0, %c1_i32 : i32
    %1 = arith.addi %0, %arg1 : i32
    %c0_i32 = arith.constant 0 : i32
    %c0_i32_0 = arith.constant 0 : i32
    return %1, %c0_i32 : i32, i32
  }
  func.func @transform_1(%arg0: i32, %arg1: i32) -> (i32, i32) {
    %c0_i32 = arith.constant 0 : i32
    %c0_i32_0 = arith.constant 0 : i32
    %c0_i32_1 = arith.constant 0 : i32
    return %c0_i32, %c0_i32_0 : i32, i32
  }
  func.func @transform_2(%arg0: i32, %arg1: i32) -> (i32, i32) {
    %c1_i32 = arith.constant 1 : i32
    %0 = arith.muli %arg0, %c1_i32 : i32
    %1 = arith.addi %0, %arg1 : i32
    %c0_i32 = arith.constant 0 : i32
    %c0_i32_0 = arith.constant 0 : i32
    return %1, %c0_i32 : i32, i32
  }
  func.func @transform_3(%arg0: i32, %arg1: i32) -> (i32, i32) {
    %c0_i32 = arith.constant 0 : i32
    %c0_i32_0 = arith.constant 0 : i32
    return %arg0, %c0_i32 : i32, i32
  }
}

</mosaic_0001>

<bundles_post_ra>
// kernel: tpu_custom_call.1
= control target key start
LH: loop header
LB: loop body
LE: loop exit
PB: predicated region body
PF: predicated region fallthrough
CT: control target
= control target key end

     0   :  { %9 = vsyncpa [#allocation3], 0  ;;  %s1263_s0 = inlined_call_operand.vmem [shape: bf16[400,16], index: 0, kind: input, shape index: {}]   ;;  %s1264_s1 = inlined_call_operand.vmem [shape: bf16[16,128], index: 1, kind: input, shape index: {}]   ;;  %s1265_s2 = inlined_call_operand.hbm [shape: f32[400,128], index: 2, kind: output, shape index: {0}]   ;;  %s1266_s3 = inlined_call_operand.hbm [shape: f32[8,128], index: 3, kind: output, shape index: {1}]  }
   0x1   :  { %v852_v0 = vld [vmem:[%s1264_s1] sm:$0xff]  ;;  %v834_v2 = vld [vmem:[%s1263_s0 + $0x38] sm:$0xff] }
   0x2   :  { %v827_v1 = vld [vmem:[%s1263_s0] sm:$0xff] }
   0x3   :  { %10 = vsyncpa [#allocation5], 0  ;;  %311 = vmatpush.bf16.msra.mxu0 %v852_v0  ;;  %vm228_vm0 = vcmask 130048   ;;  %853 = vmatpush.bf16.msra.mxu1 %v852_v0  ;;  %v841_v3 = vld [vmem:[%s1263_s0 + $0x70] sm:$0xff]  ;;  %v828_v4 = vld [vmem:[%s1263_s0 + $0x8] sm:$0xff]  ;;  %s664_s11 = sshll.u32 %s1265_s2, 4  ;;  %s665_s11 = int_to_ptr.hbm [resolvable:$true] %s664_s11 }
   0x4   :  { %854 = vmatpush.bf16.msra.mxu2 %v852_v0  ;;  %855 = vmatpush.bf16.msra.mxu3 %v852_v0  ;;  %v835_v5 = vld [vmem:[%s1263_s0 + $0x40] sm:$0xff]  ;;  %v842_v6 = vld [vmem:[%s1263_s0 + $0x78] sm:$0xff]  ;;  %v829_v7 = vld [vmem:[%s1263_s0 + $0x10] sm:$0xff]  ;;  %s914_s2 = smov 128   ;;  %s915_s12 = smov 8  }
   0x5   :  { %v836_v8 = vld [vmem:[%s1263_s0 + $0x48] sm:$0xff]  ;;  %v843_v9 = vld [vmem:[%s1263_s0 + $0x80] sm:$0xff]  ;;  %v830_v10 = vld [vmem:[%s1263_s0 + $0x18] sm:$0xff]  ;;  %s917_s13 = smov [#allocation4]   ;;  %s678_s17 = sshll.u32 %s1266_s3, 4  ;;  %s679_s17 = int_to_ptr.hbm [resolvable:$true] %s678_s17 }
   0x6   :  { %802 = vmatmul.msk.bf16.vlgmr.msra.gmra.mxu0 %vm228_vm0, %v827_v1  ;;  %809 = vmatmul.msk.bf16.vlgmr.msra.gmra.mxu1 %vm228_vm0, %v834_v2  ;;  %v837_v11 = vld [vmem:[%s1263_s0 + $0x50] sm:$0xff]  ;;  %v844_v12 = vld [vmem:[%s1263_s0 + $0x88] sm:$0xff]  ;;  %v831_v13 = vld [vmem:[%s1263_s0 + $0x20] sm:$0xff]  ;;  %s676_s14 = sshll.u32 %s917_s13, 4  ;;  %s677_s14 = int_to_ptr.vmem [resolvable:$true] %s676_s14 }
   0x7   :  { %816 = vmatmul.msk.bf16.vlgmr.msra.gmra.mxu2 %vm228_vm0, %v841_v3  ;;  %v838_v14 = vld [vmem:[%s1263_s0 + $0x58] sm:$0xff]  ;;  %v845_v15 = vld [vmem:[%s1263_s0 + $0x90] sm:$0xff]  ;;  %v848_v16 = vld [vmem:[%s1263_s0 + $0xa8] sm:$0xff] }
   0x8   :  { %823 = vmatmul.msk.bf16.vlgmr.msra.gmra.mxu3 %vm228_vm0, %v848_v16  ;;  %v832_v17 = vld [vmem:[%s1263_s0 + $0x28] sm:$0xff]  ;;  %v839_v18 = vld [vmem:[%s1263_s0 + $0x60] sm:$0xff]  ;;  %v846_v19 = vld [vmem:[%s1263_s0 + $0x98] sm:$0xff] }
   0x9   :  { %v849_v20 = vld [vmem:[%s1263_s0 + $0xb0] sm:$0xff]  ;;  %v840_v22 = vld [vmem:[%s1263_s0 + $0x68] sm:$0xff]  ;;  %v847_v23 = vld [vmem:[%s1263_s0 + $0xa0] sm:$0xff] }
   0xa   :  { %v833_v21 = vld [vmem:[%s1263_s0 + $0x30] sm:$0xff]  ;;  %v850_v24 = vld [vmem:[%s1263_s0 + $0xb8] sm:$0xff]  ;;  %v851_v25 = vld [vmem:[%s1263_s0 + $0xc0] sm:$0xff]  ;;  %s913_s0 = smov [#allocation2]  }
   0xb   :  { %s662_s8 = sshll.u32 %s913_s0, 4  ;;  %s663_s8 = int_to_ptr.vmem [resolvable:$true] %s662_s8 }
  0x16   :  { %803 = vmatmul.msk.bf16.gmra.mxu0 %vm228_vm0, %v828_v4  ;;  %810 = vmatmul.msk.bf16.gmra.mxu1 %vm228_vm0, %v835_v5 }
  0x17   :  { %817 = vmatmul.msk.bf16.gmra.mxu2 %vm228_vm0, %v842_v6 }
  0x18   :  { %824 = vmatmul.msk.bf16.gmra.mxu3 %vm228_vm0, %v849_v20 }
  0x26   :  { %804 = vmatmul.msk.bf16.gmra.mxu0 %vm228_vm0, %v829_v7  ;;  %811 = vmatmul.msk.bf16.gmra.mxu1 %vm228_vm0, %v836_v8 }
  0x27   :  { %818 = vmatmul.msk.bf16.gmra.mxu2 %vm228_vm0, %v843_v9 }
  0x28   :  { %825 = vmatmul.msk.bf16.gmra.mxu3 %vm228_vm0, %v850_v24 }
  0x36   :  { %805 = vmatmul.msk.bf16.gmra.mxu0 %vm228_vm0, %v830_v10  ;;  %812 = vmatmul.msk.bf16.gmra.mxu1 %vm228_vm0, %v837_v11 }
  0x37   :  { %819 = vmatmul.msk.bf16.gmra.mxu2 %vm228_vm0, %v844_v12 }
  0x38   :  { %826 = vmatmul.msk.bf16.gmra.mxu3 %vm228_vm0, %v851_v25 }
  0x46   :  { %806 = vmatmul.msk.bf16.gmra.mxu0 %vm228_vm0, %v831_v13  ;;  %813 = vmatmul.msk.bf16.gmra.mxu1 %vm228_vm0, %v838_v14 }
  0x47   :  { %820 = vmatmul.msk.bf16.gmra.mxu2 %vm228_vm0, %v845_v15 }
  0x56   :  { %807 = vmatmul.msk.bf16.gmra.mxu0 %vm228_vm0, %v832_v17  ;;  %814 = vmatmul.msk.bf16.gmra.mxu1 %vm228_vm0, %v839_v18 }
  0x57   :  { %821 = vmatmul.msk.bf16.gmra.mxu2 %vm228_vm0, %v846_v19 }
  0x66   :  { %808 = vmatmul.msk.bf16.gmra.mxu0 %vm228_vm0, %v833_v21  ;;  %815 = vmatmul.msk.bf16.gmra.mxu1 %vm228_vm0, %v840_v22 }
  0x67   :  { %822 = vmatmul.msk.bf16.gmra.mxu2 %vm228_vm0, %v847_v23 }
  0x83   :  { %v313_v26 = vpop.f32.mrf.mxu0  ;;  %v1041_v27 = vpop.f32.mrf.mxu1 }
  0x84   :  { %438 = vst [vmem:[#allocation2] sm:$0xff] %v313_v26  ;;  %v547_v30 = vmul.f32 %v313_v26, %v313_v26 }
  0x85   :  { %452 = vst [vmem:[#allocation2 + $0x70] sm:$0xff] %v1041_v27 }
  0x8a   :  { %v1049_v38 = vpop.f32.mrf.mxu2 }
  0x8b   :  { %v315_v28 = vpop.f32.mrf.mxu0  ;;  %v1044_v29 = vpop.f32.mrf.mxu1  ;;  %466 = vst [vmem:[#allocation2 + $0xe0] sm:$0xff] %v1049_v38 }
  0x8c   :  { %439 = vst [vmem:[#allocation2 + $0x8] sm:$0xff] %v315_v28  ;;  %v489_v31 = vadd.f32 %v315_v28, %v313_v26  ;;  %v548_v32 = vmul.f32 %v315_v28, %v315_v28  ;;  %v1099_v0 = vpop.f32.mrf.mxu3 }
  0x8d   :  { %453 = vst [vmem:[#allocation2 + $0x78] sm:$0xff] %v1044_v29 }
  0x8e   :  { %v597_v33 = vadd.f32 %v548_v32, %v547_v30  ;;  %480 = vst [vmem:[#allocation2 + $0x150] sm:$0xff] %v1099_v0 }
  0x92   :  { %v1055_v42 = vpop.f32.mrf.mxu2 }
  0x93   :  { %v318_v34 = vpop.f32.mrf.mxu0  ;;  %v1047_v35 = vpop.f32.mrf.mxu1  ;;  %467 = vst [vmem:[#allocation2 + $0xe8] sm:$0xff] %v1055_v42 }
  0x94   :  { %440 = vst [vmem:[#allocation2 + $0x10] sm:$0xff] %v318_v34  ;;  %v490_v36 = vadd.f32 %v489_v31, %v318_v34  ;;  %v549_v37 = vmul.f32 %v318_v34, %v318_v34  ;;  %v1108_v13 = vpop.f32.mrf.mxu3 }
  0x95   :  { %454 = vst [vmem:[#allocation2 + $0x80] sm:$0xff] %v1047_v35 }
  0x96   :  { %v598_v39 = vadd.f32 %v597_v33, %v549_v37  ;;  %481 = vst [vmem:[#allocation2 + $0x158] sm:$0xff] %v1108_v13 }
  0x9a   :  { %v1061_v45 = vpop.f32.mrf.mxu2 }
  0x9b   :  { %v320_v40 = vpop.f32.mrf.mxu0  ;;  %v1053_v41 = vpop.f32.mrf.mxu1  ;;  %468 = vst [vmem:[#allocation2 + $0xf0] sm:$0xff] %v1061_v45 }
  0x9c   :  { %441 = vst [vmem:[#allocation2 + $0x18] sm:$0xff] %v320_v40  ;;  %v550_v1 = vmul.f32 %v320_v40, %v320_v40  ;;  %v491_v2 = vadd.f32 %v490_v36, %v320_v40  ;;  %v1117_v31 = vpop.f32.mrf.mxu3 }
  0x9d   :  { %455 = vst [vmem:[#allocation2 + $0x88] sm:$0xff] %v1053_v41 }
  0x9e   :  { %v599_v4 = vadd.f32 %v598_v39, %v550_v1  ;;  %482 = vst [vmem:[#allocation2 + $0x160] sm:$0xff] %v1117_v31 }
  0xa2   :  { %v1067_v48 = vpop.f32.mrf.mxu2 }
  0xa3   :  { %v323_v43 = vpop.f32.mrf.mxu0  ;;  %v1059_v44 = vpop.f32.mrf.mxu1  ;;  %469 = vst [vmem:[#allocation2 + $0xf8] sm:$0xff] %v1067_v48 }
  0xa4   :  { %442 = vst [vmem:[#allocation2 + $0x20] sm:$0xff] %v323_v43  ;;  %v551_v3 = vmul.f32 %v323_v43, %v323_v43  ;;  %v492_v5 = vadd.f32 %v491_v2, %v323_v43  ;;  %v561_v2 = vmul.f32 %v1041_v27, %v1041_v27 }
  0xa5   :  { %456 = vst [vmem:[#allocation2 + $0x90] sm:$0xff] %v1059_v44 }
  0xa6   :  { %v600_v9 = vadd.f32 %v599_v4, %v551_v3 }
  0xaa   :  { %v1073_v51 = vpop.f32.mrf.mxu2 }
  0xab   :  { %v325_v46 = vpop.f32.mrf.mxu0  ;;  %v1065_v47 = vpop.f32.mrf.mxu1  ;;  %470 = vst [vmem:[#allocation2 + $0x100] sm:$0xff] %v1073_v51 }
  0xac   :  { %443 = vst [vmem:[#allocation2 + $0x28] sm:$0xff] %v325_v46  ;;  %v552_v6 = vmul.f32 %v325_v46, %v325_v46  ;;  %v493_v10 = vadd.f32 %v492_v5, %v325_v46  ;;  %v562_v5 = vmul.f32 %v1044_v29, %v1044_v29 }
  0xad   :  { %457 = vst [vmem:[#allocation2 + $0x98] sm:$0xff] %v1065_v47 }
  0xae   :  { %v601_v14 = vadd.f32 %v600_v9, %v552_v6  ;;  %v563_v9 = vmul.f32 %v1047_v35, %v1047_v35 }
  0xb2   :  { %v1079_v54 = vpop.f32.mrf.mxu2 }
  0xb3   :  { %v328_v49 = vpop.f32.mrf.mxu0  ;;  %v1071_v50 = vpop.f32.mrf.mxu1  ;;  %471 = vst [vmem:[#allocation2 + $0x108] sm:$0xff] %v1079_v54 }
  0xb4   :  { %444 = vst [vmem:[#allocation2 + $0x30] sm:$0xff] %v328_v49  ;;  %v553_v11 = vmul.f32 %v328_v49, %v328_v49  ;;  %v494_v15 = vadd.f32 %v493_v10, %v328_v49 }
  0xb5   :  { %458 = vst [vmem:[#allocation2 + $0xa0] sm:$0xff] %v1071_v50 }
  0xb6   :  { %v602_v17 = vadd.f32 %v601_v14, %v553_v11 }
  0xba   :  { %v1085_v57 = vpop.f32.mrf.mxu2 }
  0xbb   :  { %v330_v52 = vpop.f32.mrf.mxu0  ;;  %v1077_v53 = vpop.f32.mrf.mxu1  ;;  %472 = vst [vmem:[#allocation2 + $0x110] sm:$0xff] %v1085_v57 }
  0xbc   :  { %445 = vst [vmem:[#allocation2 + $0x38] sm:$0xff] %v330_v52  ;;  %v554_v16 = vmul.f32 %v330_v52, %v330_v52  ;;  %v495_v18 = vadd.f32 %v494_v15, %v330_v52 }
  0xbd   :  { %459 = vst [vmem:[#allocation2 + $0xa8] sm:$0xff] %v1077_v53 }
  0xbe   :  { %v603_v20 = vadd.f32 %v602_v17, %v554_v16 }
  0xc2   :  { %v1091_v60 = vpop.f32.mrf.mxu2 }
  0xc3   :  { %v333_v55 = vpop.f32.mrf.mxu0  ;;  %v1083_v56 = vpop.f32.mrf.mxu1  ;;  %473 = vst [vmem:[#allocation2 + $0x118] sm:$0xff] %v1091_v60 }
  0xc4   :  { %446 = vst [vmem:[#allocation2 + $0x40] sm:$0xff] %v333_v55  ;;  %v555_v19 = vmul.f32 %v333_v55, %v333_v55  ;;  %v496_v21 = vadd.f32 %v495_v18, %v333_v55 }
  0xc5   :  { %460 = vst [vmem:[#allocation2 + $0xb0] sm:$0xff] %v1083_v56 }
  0xc6   :  { %v604_v25 = vadd.f32 %v603_v20, %v555_v19 }
  0xca   :  { %v1097_v63 = vpop.f32.mrf.mxu2 }
  0xcb   :  { %v335_v58 = vpop.f32.mrf.mxu0  ;;  %v1089_v59 = vpop.f32.mrf.mxu1  ;;  %474 = vst [vmem:[#allocation2 + $0x120] sm:$0xff] %v1097_v63 }
  0xcc   :  { %447 = vst [vmem:[#allocation2 + $0x48] sm:$0xff] %v335_v58  ;;  %v556_v22 = vmul.f32 %v335_v58, %v335_v58  ;;  %v497_v26 = vadd.f32 %v496_v21, %v335_v58  ;;  %v567_v21 = vmul.f32 %v1071_v50, %v1071_v50 }
  0xcd   :  { %461 = vst [vmem:[#allocation2 + $0xb8] sm:$0xff] %v1089_v59 }
  0xce   :  { %v605_v32 = vadd.f32 %v604_v25, %v556_v22  ;;  %v568_v25 = vmul.f32 %v1077_v53, %v1077_v53 }
  0xd2   :  { %v1106_v12 = vpop.f32.mrf.mxu2 }
  0xd3   :  { %v338_v61 = vpop.f32.mrf.mxu0  ;;  %v1095_v62 = vpop.f32.mrf.mxu1  ;;  %475 = vst [vmem:[#allocation2 + $0x128] sm:$0xff] %v1106_v12 }
  0xd4   :  { %448 = vst [vmem:[#allocation2 + $0x50] sm:$0xff] %v338_v61  ;;  %v557_v28 = vmul.f32 %v338_v61, %v338_v61  ;;  %v498_v33 = vadd.f32 %v497_v26, %v338_v61  ;;  %v1126_v61 = vpop.f32.mrf.mxu3 }
  0xd5   :  { %462 = vst [vmem:[#allocation2 + $0xc0] sm:$0xff] %v1095_v62 }
  0xd6   :  { %v606_v36 = vadd.f32 %v605_v32, %v557_v28  ;;  %483 = vst [vmem:[#allocation2 + $0x168] sm:$0xff] %v1126_v61 }
  0xda   :  { %v1115_v30 = vpop.f32.mrf.mxu2 }
  0xdb   :  { %v340_v7 = vpop.f32.mrf.mxu0  ;;  %v1104_v8 = vpop.f32.mrf.mxu1  ;;  %476 = vst [vmem:[#allocation2 + $0x130] sm:$0xff] %v1115_v30 }
  0xdc   :  { %449 = vst [vmem:[#allocation2 + $0x58] sm:$0xff] %v340_v7  ;;  %v558_v34 = vmul.f32 %v340_v7, %v340_v7  ;;  %v499_v37 = vadd.f32 %v498_v33, %v340_v7  ;;  %v1145_v17 = vpop.f32.mrf.mxu3 }
  0xdd   :  { %463 = vst [vmem:[#allocation2 + $0xc8] sm:$0xff] %v1104_v8 }
  0xde   :  { %v607_v40 = vadd.f32 %v606_v36, %v558_v34  ;;  %484 = vst [vmem:[#allocation2 + $0x170] sm:$0xff] %v1145_v17 }
  0xe2   :  { %v1124_v1 = vpop.f32.mrf.mxu2 }
  0xe3   :  { %v343_v23 = vpop.f32.mrf.mxu0  ;;  %v1113_v24 = vpop.f32.mrf.mxu1  ;;  %477 = vst [vmem:[#allocation2 + $0x138] sm:$0xff] %v1124_v1 }
  0xe4   :  { %450 = vst [vmem:[#allocation2 + $0x60] sm:$0xff] %v343_v23  ;;  %v559_v39 = vmul.f32 %v343_v23, %v343_v23  ;;  %v500_v43 = vadd.f32 %v499_v37, %v343_v23  ;;  %v1163_v32 = vpop.f32.mrf.mxu3  ;;  %v571_v37 = vmul.f32 %v1095_v62, %v1095_v62 }
  0xe5   :  { %464 = vst [vmem:[#allocation2 + $0xd0] sm:$0xff] %v1113_v24 }
  0xe6   :  { %v608_v52 = vadd.f32 %v607_v40, %v559_v39  ;;  %485 = vst [vmem:[#allocation2 + $0x178] sm:$0xff] %v1163_v32 }
  0xea   :  { %v1143_v16 = vpop.f32.mrf.mxu2 }
  0xeb   :  { %v345_v46 = vpop.f32.mrf.mxu0  ;;  %v1122_v49 = vpop.f32.mrf.mxu1  ;;  %478 = vst [vmem:[#allocation2 + $0x140] sm:$0xff] %v1143_v16 }
  0xec   :  { %451 = vst [vmem:[#allocation2 + $0x68] sm:$0xff] %v345_v46  ;;  %v501_v55 = vadd.f32 %v500_v43, %v345_v46  ;;  %v560_v58 = vmul.f32 %v345_v46, %v345_v46 }
  0xed   :  { %465 = vst [vmem:[#allocation2 + $0xd8] sm:$0xff] %v1122_v49 }
  0xee   :  { %v502_v3 = vadd.f32 %v501_v55, %v1041_v27  ;;  %v609_v4 = vadd.f32 %v608_v52, %v560_v58  ;;  %v564_v27 = vmul.f32 %v1053_v41, %v1053_v41  ;;  %v1179_v52 = vpop.f32.mrf.mxu3  ;;  %v573_v58 = vmul.f32 %v1113_v24, %v1113_v24 }
  0xef   :  { %486 = vst [vmem:[#allocation2 + $0x180] sm:$0xff] %v1179_v52 }
  0xf0   :  { %v503_v6 = vadd.f32 %v502_v3, %v1044_v29  ;;  %v610_v7 = vadd.f32 %v609_v4, %v561_v2  ;;  %v565_v29 = vmul.f32 %v1059_v44, %v1059_v44  ;;  %v574_v2 = vmul.f32 %v1122_v49, %v1122_v49 }
  0xf1   :  { %v575_v3 = vmul.f32 %v1049_v38, %v1049_v38 }
  0xf2   :  { %v504_v10 = vadd.f32 %v503_v6, %v1047_v35  ;;  %v611_v11 = vadd.f32 %v610_v7, %v562_v5  ;;  %v566_v35 = vmul.f32 %v1065_v47, %v1065_v47  ;;  %v1161_v28 = vpop.f32.mrf.mxu2 }
  0xf3   :  { %479 = vst [vmem:[#allocation2 + $0x148] sm:$0xff] %v1161_v28 }
  0xf4   :  { %v505_v14 = vadd.f32 %v504_v10, %v1053_v41  ;;  %v612_v15 = vadd.f32 %v611_v11, %v563_v9 }
  0xf6   :  { %v506_v18 = vadd.f32 %v505_v14, %v1059_v44  ;;  %v613_v19 = vadd.f32 %v612_v15, %v564_v27  ;;  %v1197_v9 = vpop.f32.mrf.mxu3  ;;  %v579_v14 = vmul.f32 %v1073_v51, %v1073_v51 }
  0xf7   :  { %487 = vst [vmem:[#allocation2 + $0x188] sm:$0xff] %v1197_v9 }
  0xf8   :  { %v507_v41 = vadd.f32 %v506_v18, %v1065_v47  ;;  %v614_v20 = vadd.f32 %v613_v19, %v565_v29  ;;  %v569_v47 = vmul.f32 %v1083_v56, %v1083_v56  ;;  %670 = dma.vmem_to_hbm [thread:$0]  %s663_s8, 6400, %s665_s11, [#allocation3], %s914_s2, %s914_s2, %s915_s12   ;;  %v580_v18 = vmul.f32 %v1079_v54, %v1079_v54 }
  0xfa   :  { %v615_v22 = vadd.f32 %v614_v20, %v566_v35  ;;  %v508_v23 = vadd.f32 %v507_v41, %v1071_v50  ;;  %v570_v50 = vmul.f32 %v1089_v59, %v1089_v59  ;;  %v581_v35 = vmul.f32 %v1085_v57, %v1085_v57 }
  0xfc   :  { %v509_v44 = vadd.f32 %v508_v23, %v1077_v53  ;;  %v616_v26 = vadd.f32 %v615_v22, %v567_v21 }
  0xfe   :  { %v510_v33 = vadd.f32 %v509_v44, %v1083_v56  ;;  %v617_v34 = vadd.f32 %v616_v26, %v568_v25  ;;  %v572_v56 = vmul.f32 %v1104_v8, %v1104_v8  ;;  %v916_v44 = vmov 0.0  }
  0xff   :  { %44 = vst [vmem:[#allocation4] sm:$0xff] %v916_v44 }
 0x100   :  { %v511_v53 = vadd.f32 %v510_v33, %v1089_v59  ;;  %v618_v36 = vadd.f32 %v617_v34, %v569_v47 }
 0x102   :  { %v512_v39 = vadd.f32 %v511_v53, %v1095_v62  ;;  %v619_v40 = vadd.f32 %v618_v36, %v570_v50 }
 0x104   :  { %v513_v43 = vadd.f32 %v512_v39, %v1104_v8  ;;  %v620_v46 = vadd.f32 %v619_v40, %v571_v37  ;;  %v587_v37 = vmul.f32 %v1143_v16, %v1143_v16  ;;  %v588_v40 = vmul.f32 %v1161_v28, %v1161_v28 }
 0x106   :  { %v621_v55 = vadd.f32 %v620_v46, %v572_v56  ;;  %v514_v59 = vadd.f32 %v513_v43, %v1113_v24  ;;  %v576_v24 = vmul.f32 %v1055_v42, %v1055_v42 }
 0x108   :  { %v622_v62 = vadd.f32 %v621_v55, %v573_v58  ;;  %v515_v8 = vadd.f32 %v514_v59, %v1122_v49  ;;  %v577_v49 = vmul.f32 %v1061_v45, %v1061_v45 }
 0x10a   :  { %v516_v4 = vadd.f32 %v515_v8, %v1049_v38  ;;  %v623_v5 = vadd.f32 %v622_v62, %v574_v2  ;;  %v578_v38 = vmul.f32 %v1067_v48, %v1067_v48 }
 0x10c   :  { %v517_v6 = vadd.f32 %v516_v4, %v1055_v42  ;;  %v624_v7 = vadd.f32 %v623_v5, %v575_v3  ;;  %v594_v4 = vmul.f32 %v1163_v32, %v1163_v32 }
 0x10e   :  { %v518_v10 = vadd.f32 %v517_v6, %v1061_v45  ;;  %v625_v11 = vadd.f32 %v624_v7, %v576_v24  ;;  %v595_v6 = vmul.f32 %v1179_v52, %v1179_v52 }
 0x110   :  { %v519_v27 = vadd.f32 %v518_v10, %v1067_v48  ;;  %v626_v42 = vadd.f32 %v625_v11, %v577_v49  ;;  %v582_v48 = vmul.f32 %v1091_v60, %v1091_v60  ;;  %v596_v49 = vmul.f32 %v1197_v9, %v1197_v9 }
 0x112   :  { %v520_v15 = vadd.f32 %v519_v27, %v1073_v51  ;;  %v627_v29 = vadd.f32 %v626_v42, %v578_v38  ;;  %v583_v51 = vmul.f32 %v1097_v63, %v1097_v63 }
 0x114   :  { %v628_v45 = vadd.f32 %v627_v29, %v579_v14  ;;  %v521_v19 = vadd.f32 %v520_v15, %v1079_v54  ;;  %v584_v54 = vmul.f32 %v1106_v12, %v1106_v12 }
 0x116   :  { %v522_v41 = vadd.f32 %v521_v19, %v1085_v57  ;;  %v629_v20 = vadd.f32 %v628_v45, %v580_v18  ;;  %v488_v18 = vld [vmem:[#allocation4] sm:$0x1] }
 0x118   :  { %v523_v21 = vadd.f32 %v522_v41, %v1091_v60  ;;  %v630_v22 = vadd.f32 %v629_v20, %v581_v35  ;;  %v585_v60 = vmul.f32 %v1115_v30, %v1115_v30 }
 0x11a   :  { %v524_v23 = vadd.f32 %v523_v21, %v1097_v63  ;;  %v631_v25 = vadd.f32 %v630_v22, %v582_v48  ;;  %v586_v63 = vmul.f32 %v1124_v1, %v1124_v1 }
 0x11c   :  { %v525_v57 = vadd.f32 %v524_v23, %v1106_v12  ;;  %v632_v26 = vadd.f32 %v631_v25, %v583_v51 }
 0x11e   :  { %v526_v47 = vadd.f32 %v525_v57, %v1115_v30  ;;  %v633_v33 = vadd.f32 %v632_v26, %v584_v54  ;;  %v589_v30 = vmul.f32 %v1099_v0, %v1099_v0 }
 0x120   :  { %v634_v34 = vadd.f32 %v633_v33, %v585_v60  ;;  %v527_v50 = vadd.f32 %v526_v47, %v1124_v1  ;;  %v590_v1 = vmul.f32 %v1108_v13, %v1108_v13 }
 0x122   :  { %v635_v53 = vadd.f32 %v634_v34, %v586_v63  ;;  %v528_v36 = vadd.f32 %v527_v50, %v1143_v16  ;;  %v591_v16 = vmul.f32 %v1117_v31, %v1117_v31 }
 0x124   :  { %v636_v12 = vadd.f32 %v635_v53, %v587_v37  ;;  %v529_v39 = vadd.f32 %v528_v36, %v1161_v28  ;;  %v592_v28 = vmul.f32 %v1126_v61, %v1126_v61 }
 0x126   :  { %v530_v43 = vadd.f32 %v529_v39, %v1099_v0  ;;  %v637_v56 = vadd.f32 %v636_v12, %v588_v40  ;;  %v593_v0 = vmul.f32 %v1145_v17, %v1145_v17 }
 0x128   :  { %v531_v46 = vadd.f32 %v530_v43, %v1108_v13  ;;  %v638_v55 = vadd.f32 %v637_v56, %v589_v30 }
 0x12a   :  { %v532_v59 = vadd.f32 %v531_v46, %v1117_v31  ;;  %v639_v58 = vadd.f32 %v638_v55, %v590_v1 }
 0x12c   :  { %v640_v62 = vadd.f32 %v639_v58, %v591_v16  ;;  %v533_v8 = vadd.f32 %v532_v59, %v1126_v61 }
 0x12e   :  { %v534_v2 = vadd.f32 %v533_v8, %v1145_v17  ;;  %v641_v3 = vadd.f32 %v640_v62, %v592_v28 }
 0x130   :  { %v535_v13 = vadd.f32 %v534_v2, %v1163_v32  ;;  %v642_v5 = vadd.f32 %v641_v3, %v593_v0 }
 0x132   :  { %v643_v31 = vadd.f32 %v642_v5, %v594_v4  ;;  %v536_v24 = vadd.f32 %v535_v13, %v1179_v52  ;;  %v546_v52 = vld [vmem:[#allocation4 + $0x1] sm:$0x1] }
 0x134   :  { %v644_v7 = vadd.f32 %v643_v31, %v595_v6  ;;  %v537_v61 = vadd.f32 %v536_v24, %v1197_v9 }
 0x136   :  { %v538_v17 = vrot.slane %v537_v61, 4  ;;  %v645_v10 = vadd.f32 %v644_v7, %v596_v49 }
 0x138   :  { %v539_v11 = vadd.f32 %v538_v17, %v537_v61  ;;  %v646_v38 = vrot.slane %v645_v10, 4 }
 0x13a   :  { %v540_v27 = vrot.slane %v539_v11, 2  ;;  %v647_v42 = vadd.f32 %v646_v38, %v645_v10 }
 0x13c   :  { %v541_v32 = vadd.f32 %v540_v27, %v539_v11  ;;  %v648_v14 = vrot.slane %v647_v42, 2 }
 0x13e   :  { %v542_v15 = vrot.slane %v541_v32, 1  ;;  %v649_v29 = vadd.f32 %v648_v14, %v647_v42 }
 0x140   :  { %v543_v45 = vadd.f32 %v542_v15, %v541_v32  ;;  %v650_v19 = vrot.slane %v649_v29, 1 }
 0x142   :  { %v651_v9 = vadd.f32 %v650_v19, %v649_v29  ;;  %v544_v35 = vadd.f32 %v543_v45, %v488_v18 }
 0x144   :  { %545 = vst [vmem:[#allocation4] sm:$0x1] %v544_v35  ;;  %v652_v41 = vadd.f32 %v651_v9, %v546_v52 }
 0x146   :  { %653 = vst [vmem:[#allocation4 + $0x1] sm:$0x1] %v652_v41 }
 0x147   :  { %681 = dma.vmem_to_hbm [thread:$0]  %s677_s14, 128, %s679_s17, [#allocation5]  }
 0x148   :  { %909 = dma.done.wait [#allocation3], 6400  }
 0x149   :  { %910 = vsyncadd [#allocation3], 4294960896 }
 0x14a   :  { %911 = dma.done.wait [#allocation5], 128  }
 0x14b   :  { %912 = vsyncadd [#allocation5], 4294967168 }
 0x14c   :  { %690 = vsyncpa [#allocation3], 1 }
 0x14d   :  { %691 = vsyncpa [#allocation5], 1 }

</bundles_post_ra>
